<compile_context>
chip_gen: v6e
topology: v6e:2x2x1
jax: 0.10.0
libtpu: 0.0.40
codegen_flags: <defaults>
</compile_context>

<pallas_src>
import functools

import jax
import jax.numpy as jnp
import numpy as np
from jax.experimental import pallas as pl
from jax.experimental.pallas import tpu as pltpu

EPS = 1e-5

# ---- FLAGS stand-in (deterministic, in-script) -------------------------------
WIDTH_MULT_LIST = [0.25, 0.5, 1.0]
NUM_FEATURES_LIST = [1, 2, 4]          # one BN per width; max == 4 channels
SELECTED_IDX = WIDTH_MULT_LIST.index(max(WIDTH_MULT_LIST))   # -> the 4-channel BN

_VMEM_LIMIT_BYTES = 32 * 1024 * 1024   # explicit; fits v5e/v6e/v7x scoped budgets
_FUSED_MAX_X_BYTES = 4 * 1024 * 1024   # single-block fused path only below this size


def _divisor_tile(extent, unit, max_tile):
    """Largest divisor of `extent` that is a multiple of `unit` and <= max_tile.

    Falls back to the full extent (always a legal Pallas block size)."""
    if extent % unit != 0 or extent <= unit:
        return extent
    tile = max(unit, min(extent, (max_tile // unit) * unit))
    while extent % tile != 0:
        tile -= unit
    return tile


# --------------------------------------------------------------------------- fused
def _fused_kernel(x_ref, gamma_ref, beta_ref, o_ref, *, inv_count, eps):
    """Single pass: stats + normalize with x resident in VMEM (read x from HBM once).

    x_ref, o_ref:         (N, C, HW)  activations, HW on the lane axis
    gamma_ref, beta_ref:  (C, 1)      affine params
    """
    x = x_ref[...].astype(jnp.float32)
    # Lane (HW) reduction per (n, c) row, then fold the N planes of each channel.
    s = jnp.sum(jnp.sum(x, axis=2, keepdims=True), axis=0, keepdims=True)     # (1,C,1)
    sq = jnp.sum(jnp.sum(x * x, axis=2, keepdims=True), axis=0, keepdims=True)
    mean = s * inv_count
    var = jnp.maximum(sq * inv_count - mean * mean, 0.0)   # biased, as PyTorch training
    inv_std = jax.lax.rsqrt(var + eps)
    scale = gamma_ref[...].astype(jnp.float32)[None] * inv_std                # (1,C,1)
    shift = beta_ref[...].astype(jnp.float32)[None] - mean * scale
    o_ref[...] = (x * scale + shift).astype(o_ref.dtype)


# ------------------------------------------------------------------------ two-pass
def _stats_kernel(x_ref, gamma_ref, beta_ref, scale_ref, shift_ref,
                  sum_ref, sq_ref, *, inv_count, eps):
    """Pass 1: per-channel sum / sum-of-squares accumulated over HW tiles.

    x_ref:                (N, C, hw_tile)  activations, HW on the lane axis
    gamma_ref, beta_ref:  (C, 1)           affine params
    scale_ref, shift_ref: (C, 1)           outputs (resident across the reduction grid)
    sum_ref, sq_ref:      (C, 1)           f32 VMEM accumulators
    """
    j = pl.program_id(0)

    @pl.when(j == 0)
    def _init():
        sum_ref[...] = jnp.zeros_like(sum_ref)
        sq_ref[...] = jnp.zeros_like(sq_ref)

    x = x_ref[...].astype(jnp.float32)
    sum_ref[...] += jnp.sum(jnp.sum(x, axis=2, keepdims=True), axis=0)
    sq_ref[...] += jnp.sum(jnp.sum(x * x, axis=2, keepdims=True), axis=0)

    @pl.when(j == pl.num_programs(0) - 1)
    def _finalize():
        mean = sum_ref[...] * inv_count
        var = jnp.maximum(sq_ref[...] * inv_count - mean * mean, 0.0)
        inv_std = jax.lax.rsqrt(var + eps)
        scale = gamma_ref[...].astype(jnp.float32) * inv_std
        scale_ref[...] = scale
        shift_ref[...] = beta_ref[...].astype(jnp.float32) - mean * scale


def _normalize_kernel(x_ref, scale_ref, shift_ref, o_ref):
    """Pass 2: y = x * scale + shift, lane-dense tiles, one FMA per element.

    x_ref, o_ref:         (r_tile, hw_tile)  rows = flattened (N, C), lanes = HW
    scale_ref, shift_ref: (r_tile, 1)        per-row (== per-channel) folded affine
    """
    x = x_ref[...].astype(jnp.float32)
    o_ref[...] = (x * scale_ref[...] + shift_ref[...]).astype(o_ref.dtype)


def switchable_batchnorm2d(x_nchw, gammas, betas, idx=SELECTED_IDX, eps=EPS,
                           target_block_bytes=1 << 20, allow_fused=True):
    """Applies bn[idx] (training-mode BatchNorm2d) to an NCHW input via Pallas."""
    gamma = gammas[idx]
    beta = betas[idx]
    n, c, h, w = x_nchw.shape
    assert c == gamma.shape[0], "selected BN must match input channel count"
    hw = h * w
    nc = n * c
    itemsize = x_nchw.dtype.itemsize
    x_bytes = nc * hw * itemsize

    # Free (layout-preserving) reshapes -- no NCHW<->NHWC transpose round trips.
    x3d = x_nchw.reshape(n, c, hw)       # stats view: channels on sublanes, HW on lanes
    gamma2d = gamma.reshape(c, 1).astype(jnp.float32)
    beta2d = beta.reshape(c, 1).astype(jnp.float32)
    inv_count = 1.0 / float(n * hw)

    # --------------------------------------------------- fused path (x fits in VMEM)
    if allow_fused and x_bytes <= _FUSED_MAX_X_BYTES:
        y3d = pl.pallas_call(
            functools.partial(_fused_kernel, inv_count=inv_count, eps=float(eps)),
            out_shape=jax.ShapeDtypeStruct((n, c, hw), x_nchw.dtype),
            grid_spec=pltpu.PrefetchScalarGridSpec(
                num_scalar_prefetch=0,
                grid=(1,),
                in_specs=[
                    pl.BlockSpec((n, c, hw), lambda i: (0, 0, 0)),
                    pl.BlockSpec((c, 1), lambda i: (0, 0)),
                    pl.BlockSpec((c, 1), lambda i: (0, 0)),
                ],
                out_specs=pl.BlockSpec((n, c, hw), lambda i: (0, 0, 0))),
            compiler_params=pltpu.CompilerParams(
                dimension_semantics=("arbitrary",),
                vmem_limit_bytes=_VMEM_LIMIT_BYTES),
            cost_estimate=pl.CostEstimate(
                flops=5 * nc * hw,
                transcendentals=c,
                bytes_accessed=2 * nc * hw * itemsize + 2 * c * 4),
        )(x3d, gamma2d, beta2d)
        return y3d.reshape(n, c, h, w)

    # ---------------------------------------------------------------- pass 1: stats
    x2d = x_nchw.reshape(nc, hw)         # normalize view: lane-dense HW, dense sublanes
    hw_tile_s = _divisor_tile(hw, 128, max(128, target_block_bytes // (nc * itemsize)))
    grid_s = (hw // hw_tile_s,)
    scale, shift = pl.pallas_call(
        functools.partial(_stats_kernel, inv_count=inv_count, eps=float(eps)),
        out_shape=(jax.ShapeDtypeStruct((c, 1), jnp.float32),
                   jax.ShapeDtypeStruct((c, 1), jnp.float32)),
        grid_spec=pltpu.PrefetchScalarGridSpec(
            num_scalar_prefetch=0,
            grid=grid_s,
            in_specs=[
                pl.BlockSpec((n, c, hw_tile_s), lambda j: (0, 0, j)),
                pl.BlockSpec((c, 1), lambda j: (0, 0)),
                pl.BlockSpec((c, 1), lambda j: (0, 0)),
            ],
            out_specs=[
                pl.BlockSpec((c, 1), lambda j: (0, 0)),
                pl.BlockSpec((c, 1), lambda j: (0, 0)),
            ],
            scratch_shapes=[pltpu.VMEM((c, 1), jnp.float32),
                            pltpu.VMEM((c, 1), jnp.float32)]),
        compiler_params=pltpu.CompilerParams(
            dimension_semantics=("arbitrary",),           # reduction axis
            vmem_limit_bytes=_VMEM_LIMIT_BYTES),
        cost_estimate=pl.CostEstimate(
            flops=3 * nc * hw,
            transcendentals=c,
            bytes_accessed=nc * hw * itemsize + 4 * c * 4),
    )(x3d, gamma2d, beta2d)

    # Expand per-channel scale/shift to per-row (row = n*C + c); tiny (N*C, 1) arrays.
    scale_rows = jnp.tile(scale, (n, 1))
    shift_rows = jnp.tile(shift, (n, 1))

    # ------------------------------------------------------------ pass 2: normalize
    r_tile = _divisor_tile(nc, 8, 256)
    hw_tile_n = _divisor_tile(hw, 128,
                              max(128, target_block_bytes // (r_tile * itemsize)))
    grid_n = (nc // r_tile, hw // hw_tile_n)
    y2d = pl.pallas_call(
        _normalize_kernel,
        out_shape=jax.ShapeDtypeStruct((nc, hw), x_nchw.dtype),
        grid_spec=pltpu.PrefetchScalarGridSpec(
            num_scalar_prefetch=0,
            grid=grid_n,
            in_specs=[
                pl.BlockSpec((r_tile, hw_tile_n), lambda i, j: (i, j)),
                pl.BlockSpec((r_tile, 1), lambda i, j: (i, 0)),
                pl.BlockSpec((r_tile, 1), lambda i, j: (i, 0)),
            ],
            out_specs=pl.BlockSpec((r_tile, hw_tile_n), lambda i, j: (i, j))),
        compiler_params=pltpu.CompilerParams(
            dimension_semantics=("parallel", "parallel"),  # megacore-friendly
            vmem_limit_bytes=_VMEM_LIMIT_BYTES),
        cost_estimate=pl.CostEstimate(
            flops=2 * nc * hw,
            transcendentals=0,
            bytes_accessed=2 * nc * hw * itemsize),
    )(x2d, scale_rows, shift_rows)

    # (N*C, HW) -> NCHW (free reshape)
    return y2d.reshape(n, c, h, w)


def _reference(x_nchw, gamma, beta):
    xf = x_nchw.astype(jnp.float32)
    mean = jnp.mean(xf, axis=(0, 2, 3), keepdims=True)
    var = jnp.mean((xf - mean) ** 2, axis=(0, 2, 3), keepdims=True)
    g = gamma.reshape(1, -1, 1, 1)
    b = beta.reshape(1, -1, 1, 1)
    return ((xf - mean) * jax.lax.rsqrt(var + EPS) * g + b).astype(x_nchw.dtype)


if __name__ == "__main__":
    key = jax.random.PRNGKey(0)
    kx, *kparams = jax.random.split(key, 1 + 2 * len(NUM_FEATURES_LIST))

    # input: NCHW, channels = max(num_features_list) = 4
    x = jax.random.normal(kx, (2, 4, 16, 16), dtype=jnp.float32)

    # Deterministic parameters for every BN in the ModuleList (shapes per __init__).
    gammas, betas = [], []
    for i, nf in enumerate(NUM_FEATURES_LIST):
        gammas.append(1.0 + 0.1 * jax.random.normal(kparams[2 * i], (nf,), dtype=jnp.float32))
        betas.append(0.1 * jax.random.normal(kparams[2 * i + 1], (nf,), dtype=jnp.float32))
    # TODO(synk): running_mean/running_var updates are training-time side effects (not part
    # of the returned value); if needed they can be emitted as extra (C,1) outputs of pass 1.

    y_ref = _reference(x, gammas[SELECTED_IDX], betas[SELECTED_IDX])

    # Fused single-pass path (default for small/medium activations).
    y = jax.block_until_ready(switchable_batchnorm2d(x, gammas, betas))
    np.testing.assert_allclose(np.asarray(y), np.asarray(y_ref), rtol=3e-5, atol=3e-5)

    # Two-pass gridded path (fallback for large activations), forced with tiny tiles to
    # exercise the multi-step accumulator / software-pipelined code path.
    y_two_pass = jax.block_until_ready(
        switchable_batchnorm2d(x, gammas, betas,
                               target_block_bytes=2048, allow_fused=False))
    np.testing.assert_allclose(np.asarray(y_two_pass), np.asarray(y_ref),
                               rtol=3e-5, atol=3e-5)

    print("KERNEL_OK")
</pallas_src>

<mosaic_0001>
module attributes {stable_mosaic.version = 11 : i64} {
  func.func @_fused_kernel(%arg0: i32, %arg1: memref<2x4x256xf32, #tpu.memory_space<vmem>>, %arg2: memref<4x1xf32, #tpu.memory_space<vmem>>, %arg3: memref<4x1xf32, #tpu.memory_space<vmem>>, %arg4: memref<2x4x256xf32, #tpu.memory_space<vmem>>) attributes {dimension_semantics = [#tpu.dimension_semantics<arbitrary>], iteration_bounds = array<i64: 1>, scalar_prefetch = 0 : i64, scratch_operands = 0 : i64, tpu.core_type = #tpu.core_type<tc>, window_params = [{pipeline_mode = #tpu.pipeline_mode<synchronous>, transform_indices = @transform_0, window_bounds = array<i64: 2, 4, 256>}, {pipeline_mode = #tpu.pipeline_mode<synchronous>, transform_indices = @transform_1, window_bounds = array<i64: 4, 1>}, {pipeline_mode = #tpu.pipeline_mode<synchronous>, transform_indices = @transform_2, window_bounds = array<i64: 4, 1>}, {pipeline_mode = #tpu.pipeline_mode<synchronous>, transform_indices = @transform_3, window_bounds = array<i64: 2, 4, 256>}]} {
    %c0 = arith.constant 0 : index
    %c0_0 = arith.constant 0 : index
    %c0_1 = arith.constant 0 : index
    %0 = vector.load %arg1[%c0, %c0_0, %c0_1] : memref<2x4x256xf32, #tpu.memory_space<vmem>>, vector<2x4x256xf32>
    %cst = arith.constant dense<0.000000e+00> : vector<2x4xf32>
    %1 = vector.multi_reduction <add>, %0, %cst [2] : vector<2x4x256xf32> to vector<2x4xf32>
    %2 = vector.shape_cast %1 : vector<2x4xf32> to vector<2x4x1xf32>
    %cst_2 = arith.constant dense<0.000000e+00> : vector<4x1xf32>
    %3 = vector.multi_reduction <add>, %2, %cst_2 [0] : vector<2x4x1xf32> to vector<4x1xf32>
    %4 = vector.shape_cast %3 : vector<4x1xf32> to vector<1x4x1xf32>
    %5 = arith.mulf %0, %0 : vector<2x4x256xf32>
    %cst_3 = arith.constant dense<0.000000e+00> : vector<2x4xf32>
    %6 = vector.multi_reduction <add>, %5, %cst_3 [2] : vector<2x4x256xf32> to vector<2x4xf32>
    %7 = vector.shape_cast %6 : vector<2x4xf32> to vector<2x4x1xf32>
    %cst_4 = arith.constant dense<0.000000e+00> : vector<4x1xf32>
    %8 = vector.multi_reduction <add>, %7, %cst_4 [0] : vector<2x4x1xf32> to vector<4x1xf32>
    %9 = vector.shape_cast %8 : vector<4x1xf32> to vector<1x4x1xf32>
    %cst_5 = arith.constant 0.001953125 : f32
    %10 = vector.broadcast %cst_5 : f32 to vector<1x4x1xf32>
    %11 = arith.mulf %4, %10 : vector<1x4x1xf32>
    %cst_6 = arith.constant 0.001953125 : f32
    %12 = vector.broadcast %cst_6 : f32 to vector<1x4x1xf32>
    %13 = arith.mulf %9, %12 : vector<1x4x1xf32>
    %14 = arith.mulf %11, %11 : vector<1x4x1xf32>
    %15 = arith.subf %13, %14 : vector<1x4x1xf32>
    %cst_7 = arith.constant 0.000000e+00 : f32
    %16 = vector.broadcast %cst_7 : f32 to vector<1x4x1xf32>
    %17 = arith.maximumf %15, %16 : vector<1x4x1xf32>
    %cst_8 = arith.constant 9.99999974E-6 : f32
    %18 = vector.broadcast %cst_8 : f32 to vector<1x4x1xf32>
    %19 = arith.addf %17, %18 : vector<1x4x1xf32>
    %20 = math.rsqrt %19 : vector<1x4x1xf32>
    %c0_9 = arith.constant 0 : index
    %c0_10 = arith.constant 0 : index
    %21 = vector.load %arg2[%c0_9, %c0_10] : memref<4x1xf32, #tpu.memory_space<vmem>>, vector<4x1xf32>
    %22 = vector.shape_cast %21 : vector<4x1xf32> to vector<1x4x1xf32>
    %23 = arith.mulf %22, %20 : vector<1x4x1xf32>
    %c0_11 = arith.constant 0 : index
    %c0_12 = arith.constant 0 : index
    %24 = vector.load %arg3[%c0_11, %c0_12] : memref<4x1xf32, #tpu.memory_space<vmem>>, vector<4x1xf32>
    %25 = vector.shape_cast %24 : vector<4x1xf32> to vector<1x4x1xf32>
    %26 = arith.mulf %11, %23 : vector<1x4x1xf32>
    %27 = arith.subf %25, %26 : vector<1x4x1xf32>
    %28 = vector.broadcast %23 : vector<1x4x1xf32> to vector<2x4x256xf32>
    %29 = arith.mulf %0, %28 : vector<2x4x256xf32>
    %30 = vector.broadcast %27 : vector<1x4x1xf32> to vector<2x4x256xf32>
    %31 = arith.addf %29, %30 : vector<2x4x256xf32>
    %c0_13 = arith.constant 0 : index
    %c0_14 = arith.constant 0 : index
    %c0_15 = arith.constant 0 : index
    %32 = vector.load %arg4[%c0_13, %c0_14, %c0_15] : memref<2x4x256xf32, #tpu.memory_space<vmem>>, vector<2x4x256xf32>
    tpu.vector_store %arg4[%c0_13, %c0_14, %c0_15], %31 {strides = array<i32>} : memref<2x4x256xf32, #tpu.memory_space<vmem>>, vector<2x4x256xf32>,
    return
  }
  func.func @transform_0(%arg0: i32) -> (i32, i32, i32) {
    %c0_i32 = arith.constant 0 : i32
    %c0_i32_0 = arith.constant 0 : i32
    %c0_i32_1 = arith.constant 0 : i32
    %c0_i32_2 = arith.constant 0 : i32
    return %c0_i32, %c0_i32_0, %c0_i32_1 : i32, i32, i32
  }
  func.func @transform_1(%arg0: i32) -> (i32, i32) {
    %c0_i32 = arith.constant 0 : i32
    %c0_i32_0 = arith.constant 0 : i32
    %c0_i32_1 = arith.constant 0 : i32
    return %c0_i32, %c0_i32_0 : i32, i32
  }
  func.func @transform_2(%arg0: i32) -> (i32, i32) {
    %c0_i32 = arith.constant 0 : i32
    %c0_i32_0 = arith.constant 0 : i32
    %c0_i32_1 = arith.constant 0 : i32
    return %c0_i32, %c0_i32_0 : i32, i32
  }
  func.func @transform_3(%arg0: i32) -> (i32, i32, i32) {
    %c0_i32 = arith.constant 0 : i32
    %c0_i32_0 = arith.constant 0 : i32
    %c0_i32_1 = arith.constant 0 : i32
    %c0_i32_2 = arith.constant 0 : i32
    return %c0_i32, %c0_i32_0, %c0_i32_1 : i32, i32, i32
  }
}

</mosaic_0001>

<bundles_post_ra>
// kernel: tpu_custom_call.1
= control target key start
LH: loop header
LB: loop body
LE: loop exit
PB: predicated region body
PF: predicated region fallthrough
CT: control target
= control target key end

     0   :  { %8 = vsyncpa [#allocation3], 0  ;;  %s259_s0 = inlined_call_operand.hbm [shape: f32[2,4,256], index: 0, kind: input, shape index: {}]   ;;  %s260_s1 = inlined_call_operand.vmem [shape: f32[4,1], index: 1, kind: input, shape index: {}]   ;;  %s261_s2 = inlined_call_operand.vmem [shape: f32[4,1], index: 2, kind: input, shape index: {}]   ;;  %s262_s3 = inlined_call_operand.hbm [shape: f32[2,4,256], index: 3, kind: output, shape index: {}]  }
   0x1   :  { %9 = vsyncpa [#allocation4], 0  ;;  %s187_s12 = smov [#allocation2]  }
   0x2   :  { %s15_s13 = sshll.u32 %s187_s12, 4  ;;  %s16_s13 = int_to_ptr.vmem [resolvable:$true] %s15_s13 }
   0x3   :  { %s151_s14 = scalar_lea.vmem %s16_s13, 256  ;;  %p156_p1 = scmp.lt.s32.totalorder %s16_s13, %s16_s13 }
   0x4   :  { %p152_p0 = scmp.ne.s32.totalorder %s16_s13, %s151_s14  ;;  %p157_p2 = scmp.lt.s32.totalorder %s151_s14, %s151_s14 }
   0x6   :  { %p158_p3 = por %p157_p2, %p156_p1 }
   0x8   :  { %p159_p4 = pnand %p158_p3, %p152_p0 }
   0xa   :  { %162 = shalt.err (!%p159_p4)
}
   0xb   :  { %s188_s15 = smov 128   ;;  %s189_s16 = smov 8  }
   0xc   :  { %21 = dma.hbm_to_vmem [thread:$0]  %s259_s0, 256, %s16_s13, [#allocation3], %s188_s15, %s188_s15, %s189_s16  }
   0xd   :  { %183 = dma.done.wait [#allocation3], 256  }
   0xe   :  { %184 = vsyncadd [#allocation3], 4294967040  ;;  %vm37_vm0 = vcmask 1043456   ;;  %v219_v0 = vld [vmem:[#allocation2] sm:$0xff]  ;;  %v221_v1 = vld [vmem:[#allocation2 + $0x8] sm:$0xff]  ;;  %v190_v20 = vmov 0   ;;  %v91_v45 = vlaneseq }
   0xf   :  { %v33_v2 = vcombine.high %v219_v0, %v219_v0  ;;  %v38_v3 = vsel %vm37_vm0, %v219_v0, 0.0  ;;  %v51_v4 = vmul.f32 %v219_v0, %v219_v0  ;;  %v34_v5 = vcombine.high %v221_v1, %v221_v1  ;;  %137 = vset.pattern.permute.xlu0 %v190_v20  ;;  %138 = vset.pattern.permute.xlu1 %v190_v20  ;;  %v79_v37 = vld [vmem:[%s260_s1] sm:$0xf]  ;;  %s192_s1 = smov [#allocation5]  }
  0x10   :  { %v43_v6 = vsel %vm37_vm0, %v221_v1, 0.0  ;;  %v52_v7 = vmul.f32 %v221_v1, %v221_v1  ;;  %v81_v40 = vld [vmem:[%s261_s2] sm:$0xf]  ;;  %v191_v43 = vmov 839922192   ;;  %v92_v47 = vshrl.u32 %v91_v45, 7 }
  0x11   :  { %v39_v8 = vsel %vm37_vm0, %v33_v2, 0.0  ;;  %v55_v9 = vcombine.high %v51_v4, %v51_v4  ;;  %v59_v10 = vsel %vm37_vm0, %v51_v4, 0.0  ;;  %v44_v11 = vsel %vm37_vm0, %v34_v5, 0.0  ;;  %s119_s22 = sshll.u32 %s192_s1, 4  ;;  %s120_s22 = int_to_ptr.vmem [resolvable:$true] %s119_s22 }
  0x12   :  { %v40_v12 = vadd.f32 %v39_v8, %v38_v3  ;;  %v56_v13 = vcombine.high %v52_v7, %v52_v7  ;;  %v64_v15 = vsel %vm37_vm0, %v52_v7, 0.0  ;;  %v45_v17 = vadd.f32 %v44_v11, %v43_v6  ;;  %s163_s2 = scalar_lea.vmem %s120_s22, 256  ;;  %p168_p6 = scmp.lt.s32.totalorder %s120_s22, %s120_s22 }
  0x13   :  { %v60_v14 = vsel %vm37_vm0, %v55_v9, 0.0  ;;  %v89_v44 = vunpack.c.l.s4 %v191_v43  ;;  %p164_p5 = scmp.ne.s32.totalorder %s120_s22, %s163_s2  ;;  %p169_p7 = scmp.lt.s32.totalorder %s163_s2, %s163_s2 }
  0x14   :  { %41 = vadd.xlane.f32.xlu0 %v40_v12  ;;  %v61_v16 = vadd.f32 %v60_v14, %v59_v10  ;;  %v65_v18 = vsel %vm37_vm0, %v56_v13, 0.0 }
  0x15   :  { %v66_v19 = vadd.f32 %v65_v18, %v64_v15  ;;  %v90_v46 = vunpack.c.0.s8 %v89_v44  ;;  %p170_p8 = por %p169_p7, %p168_p6 }
  0x16   :  { %62 = vadd.xlane.f32.xlu1 %v61_v16 }
  0x17   :  { %v93_v48 = vsub.s32 %v90_v46, %v92_v47  ;;  %p171_p9 = pnand %p170_p8, %p164_p5 }
  0x18   :  { %46 = vadd.xlane.f32.xlu0 %v45_v17 }
  0x1a   :  { %67 = vadd.xlane.f32.xlu1 %v66_v19 }
  0x9d   :  { %v42_v21 = vpop.xlane.xlu0 %41 }
  0x9e   :  { %v48_v24 = vsel %vm37_vm0, %v42_v21, 0.0 }
  0x9f   :  { %v63_v22 = vpop.xlane.xlu1 %62 }
  0xa0   :  { %v69_v28 = vsel %vm37_vm0, %v63_v22, 0.0 }
  0xa1   :  { %v47_v23 = vpop.xlane.xlu0 %46 }
  0xa2   :  { %v49_v25 = vsel %vm37_vm0, %v47_v23, 0.0 }
  0xa3   :  { %v50_v26 = vadd.f32 %v49_v25, %v48_v24  ;;  %v68_v27 = vpop.xlane.xlu1 %67 }
  0xa4   :  { %v70_v29 = vsel %vm37_vm0, %v68_v27, 0.0 }
  0xa5   :  { %v72_v30 = vmul.f32 0.001953125, %v50_v26  ;;  %v71_v31 = vadd.f32 %v70_v29, %v69_v28 }
  0xa7   :  { %v74_v32 = vmul.f32 %v72_v30, %v72_v30  ;;  %v73_v33 = vmul.f32 0.001953125, %v71_v31 }
  0xa9   :  { %v75_v34 = vsub.f32 %v73_v33, %v74_v32 }
  0xab   :  { %v76_v35 = vmax.f32 %v75_v34, 0.0 }
  0xad   :  { %v77_v36 = vadd.f32 1e-05, %v76_v35 }
  0xaf   :  { %141 = vrsqrt.f32 %v77_v36 }
  0xbc   :  { %v142_v38 = vpop.eup %141 }
  0xbd   :  { %v80_v39 = vmul.f32 %v142_v38, %v79_v37 }
  0xbf   :  { %86 = vperm.xlu0 %137, %v80_v39   ;;  %v82_v41 = vmul.f32 %v80_v39, %v72_v30 }
  0xc1   :  { %v83_v42 = vsub.f32 %v81_v40, %v82_v41 }
  0xc3   :  { %100 = vperm.xlu1 %138, %v83_v42  }
 0x13a   :  { %v87_v49 = vpop.permute.xlu0 %86 }
 0x13b   :  { %v94_v50 = vrot.slane %v87_v49, %v93_v48 }
 0x13d   :  { %v96_v52 = vmul.f32 %v94_v50, %v219_v0  ;;  %v97_v53 = vmul.f32 %v94_v50, %v221_v1 }
 0x13e   :  { %v101_v51 = vpop.permute.xlu1 %100 }
 0x13f   :  { %v108_v54 = vrot.slane %v101_v51, %v93_v48 }
 0x141   :  { %v110_v55 = vadd.f32 %v108_v54, %v96_v52  ;;  %v111_v56 = vadd.f32 %v108_v54, %v97_v53 }
 0x143   :  { %112 = vst [vmem:[#allocation5] sm:$0xff] %v110_v55  ;;  %113 = vst [vmem:[#allocation5 + $0x8] sm:$0xff] %v111_v56 }
 0x144   :  { %174 = shalt.err (!%p171_p9)
}
 0x145   :  { %125 = dma.vmem_to_hbm [thread:$0]  %s120_s22, 256, %s262_s3, [#allocation4], %s188_s15, %s188_s15, %s189_s16  }
 0x146   :  { %185 = dma.done.wait [#allocation4], 256  }
 0x147   :  { %186 = vsyncadd [#allocation4], 4294967040 }
 0x148   :  { %129 = vsyncpa [#allocation3], 1 }
 0x149   :  { %130 = vsyncpa [#allocation4], 1 }

</bundles_post_ra>
